<compile_context>
chip_gen: v6e
topology: v6e:2x2x1
jax: 0.10.0
libtpu: 0.0.40
codegen_flags: <defaults>
</compile_context>

<pallas_src>
import functools
import math

import jax
import jax.numpy as jnp
import numpy as np
from jax import lax
from jax.experimental import pallas as pl
from jax.experimental.pallas import tpu as pltpu

_VMEM_LIMIT = 48 * 1024 * 1024  # explicit scoped-VMEM budget; safe on v5e/v6e and v7x (64 MiB)


def _cparams(*semantics):
    return pltpu.CompilerParams(dimension_semantics=semantics,
                                vmem_limit_bytes=_VMEM_LIMIT)


# ----------------------------------------------------------------------------
# tile-size helpers (bounded VMEM, (8,128)-friendly; fall back to full dim for tiny arrays)
# ----------------------------------------------------------------------------
def _row_tile(n, target=512):
    """Largest multiple of 8 that divides n and is <= target (sublane axis)."""
    if n % 8 != 0:
        return n
    t = min(n, target)
    t -= t % 8
    while n % t != 0:
        t -= 8
    return t


def _lane_tile(n, target=1024):
    """Largest multiple of 128 that divides n and is <= target, else full n (lane axis)."""
    if n % 128 != 0:
        return n
    t = min(n, target)
    t -= t % 128
    while n % t != 0:
        t -= 128
    return t


# ----------------------------------------------------------------------------
# Kernel 1: typed linear  --  y[n] = x[n] @ W[ntype[n]]
# Grid (row tiles [parallel], node types [arbitrary]); output block resident across the
# type axis; masked merge per type (each row hits exactly one type -> no add needed).
# Fused k/v/q: W is the concatenation w_k | w_v | w_q.
# ----------------------------------------------------------------------------
def _typed_linear_kernel(ntype_ref, x_ref, w_ref, o_ref):
    t = pl.program_id(1)

    @pl.when(t == 0)
    def _():
        o_ref[...] = jnp.zeros_like(o_ref)

    y = jnp.dot(x_ref[...], w_ref[0], preferred_element_type=jnp.float32)   # (TM, Dout)
    mask = ntype_ref[...] == t                                              # (TM, 1)
    o_ref[...] = jnp.where(mask, y, o_ref[...])


def typed_linear(x, w, ntype2d):
    n, d_in = x.shape
    num_types, _, d_out = w.shape
    tm = _row_tile(n)
    return pl.pallas_call(
        _typed_linear_kernel,
        out_shape=jax.ShapeDtypeStruct((n, d_out), jnp.float32),
        grid=(n // tm, num_types),
        in_specs=[
            pl.BlockSpec((tm, 1), lambda i, t: (i, 0)),
            pl.BlockSpec((tm, d_in), lambda i, t: (i, 0)),
            pl.BlockSpec((1, d_in, d_out), lambda i, t: (t, 0, 0)),
        ],
        out_specs=pl.BlockSpec((tm, d_out), lambda i, t: (i, 0)),
        compiler_params=_cparams("parallel", "arbitrary"),
    )(ntype2d, x, w)


# ----------------------------------------------------------------------------
# Kernel 2: per-edge attention logits + messages (HGTConv.message)
# One (2HD,2HD) block-diagonal relation matmul per edge type acting on [k || v]:
# first HD columns -> k @ W_att (pri/sqrt(D) pre-folded), last HD columns -> v @ W_msg.
# Per-head dot-product reduction via a constant (HD,H) selector matmul.
# Logit path in f32; message output stored as bf16 (halves the agg kernel's m stream).
# ----------------------------------------------------------------------------
def _edge_kernel(etype_ref, kv_ref, q_ref, wrel_ref, sel_ref, a_ref, m_ref, *, hd):
    t = pl.program_id(1)

    @pl.when(t == 0)
    def _():
        a_ref[...] = jnp.zeros_like(a_ref)
        m_ref[...] = jnp.zeros_like(m_ref)

    emask = etype_ref[...] == t                                             # (TE, 1)
    kwmsg = jnp.dot(kv_ref[...], wrel_ref[0],
                    preferred_element_type=jnp.float32)                     # (TE, 2HD)
    kw = kwmsg[:, :hd]                                                      # (TE, HD)
    msg = kwmsg[:, hd:]                                                     # (TE, HD)
    a = jnp.dot(kw * q_ref[...], sel_ref[...],
                preferred_element_type=jnp.float32)                         # (TE, H)
    a_ref[...] = jnp.where(emask, a, a_ref[...])
    m_ref[...] = jnp.where(emask, msg.astype(m_ref.dtype), m_ref[...])


def edge_attention(ekv, eq, etype2d, w_rel_bd, sel):
    e, hd2 = ekv.shape
    hd = hd2 // 2
    num_etypes = w_rel_bd.shape[0]
    h = sel.shape[1]
    te = _row_tile(e)
    return pl.pallas_call(
        functools.partial(_edge_kernel, hd=hd),
        out_shape=(jax.ShapeDtypeStruct((e, h), jnp.float32),
                   jax.ShapeDtypeStruct((e, hd), jnp.bfloat16)),
        grid=(e // te, num_etypes),
        in_specs=[
            pl.BlockSpec((te, 1), lambda i, t: (i, 0)),
            pl.BlockSpec((te, hd2), lambda i, t: (i, 0)),
            pl.BlockSpec((te, hd), lambda i, t: (i, 0)),
            pl.BlockSpec((1, hd2, hd2), lambda i, t: (t, 0, 0)),
            pl.BlockSpec((hd, h), lambda i, t: (0, 0)),
        ],
        out_specs=(pl.BlockSpec((te, h), lambda i, t: (i, 0)),
                   pl.BlockSpec((te, hd), lambda i, t: (i, 0))),
        compiler_params=_cparams("parallel", "arbitrary"),
    )(etype2d, ekv, eq, w_rel_bd, sel)


# ----------------------------------------------------------------------------
# Kernel 3: edge softmax + destination aggregation (update_all copy_e / sum)
# Grid (node tiles [parallel], edge tiles [arbitrary, innermost reduction]).
# The one-hot incidence tile is built IN-KERNEL from the dst indices (no (N,E) HBM stream);
# exp / head-expansion / numerator are computed in VMEM from a, amax[dst], m.
# Running num/den accumulators live in VMEM scratch; divide + single wide store at the end.
# bf16 MXU operands (mask is exactly 0/1 in bf16), f32 accumulation.
# ----------------------------------------------------------------------------
def _agg_kernel(dst_ref, a_ref, amax_ref, m_ref, exp_ref, o_ref,
                acc_num_ref, acc_den_ref, *, tn):
    j = pl.program_id(1)

    @pl.when(j == 0)
    def _():
        acc_num_ref[...] = jnp.zeros_like(acc_num_ref)
        acc_den_ref[...] = jnp.zeros_like(acc_den_ref)

    te = dst_ref.shape[1]
    row_base = pl.program_id(0) * tn
    node_ids = row_base + lax.broadcasted_iota(jnp.int32, (tn, te), 0)      # (TN, TE)
    inc = jnp.where(node_ids == dst_ref[...], 1.0, 0.0).astype(jnp.bfloat16)

    ea = jnp.exp(a_ref[...] - amax_ref[...])                                # (TE, H) f32, EUP
    ea_full = jnp.dot(ea, exp_ref[...],
                      preferred_element_type=jnp.float32)                   # (TE, HD)
    rhs = (ea_full * m_ref[...].astype(jnp.float32)).astype(jnp.bfloat16)   # (TE, HD)

    acc_num_ref[...] += jnp.dot(inc, rhs, preferred_element_type=jnp.float32)
    acc_den_ref[...] += jnp.dot(inc, ea.astype(jnp.bfloat16),
                                preferred_element_type=jnp.float32)

    @pl.when(j == pl.num_programs(1) - 1)
    def _():
        den = acc_den_ref[...]
        inv = jnp.where(den > 0.0, 1.0 / jnp.maximum(den, 1e-30), 0.0)      # safe divide
        inv_full = jnp.dot(inv, exp_ref[...],
                           preferred_element_type=jnp.float32)              # (TN, HD)
        o_ref[...] = acc_num_ref[...] * inv_full


def softmax_aggregate(dst2d, a, amax_e, m, expander, n):
    e = dst2d.shape[1]
    h = a.shape[1]
    hd = m.shape[1]
    tn = _row_tile(n)
    te = _lane_tile(e)
    return pl.pallas_call(
        functools.partial(_agg_kernel, tn=tn),
        out_shape=jax.ShapeDtypeStruct((n, hd), jnp.float32),
        grid=(n // tn, e // te),
        in_specs=[
            pl.BlockSpec((1, te), lambda i, j: (0, j)),
            pl.BlockSpec((te, h), lambda i, j: (j, 0)),
            pl.BlockSpec((te, h), lambda i, j: (j, 0)),
            pl.BlockSpec((te, hd), lambda i, j: (j, 0)),
            pl.BlockSpec((h, hd), lambda i, j: (0, 0)),
        ],
        out_specs=pl.BlockSpec((tn, hd), lambda i, j: (i, 0)),
        scratch_shapes=[pltpu.VMEM((tn, hd), jnp.float32),
                        pltpu.VMEM((tn, h), jnp.float32)],
        compiler_params=_cparams("parallel", "arbitrary"),
    )(dst2d, a, amax_e, m, expander)


# ----------------------------------------------------------------------------
# Kernel 4: final typed linear (w_a) fused with the sigmoid-gated skip connection
#   out = (h @ w_a[ntype]) * sigmoid(skip[ntype]) + x * (1 - sigmoid(skip[ntype]))
# ----------------------------------------------------------------------------
def _typed_linear_skip_kernel(ntype_ref, h_ref, w_ref, x_ref, gate_ref, o_ref):
    t = pl.program_id(1)

    @pl.when(t == 0)
    def _():
        o_ref[...] = jnp.zeros_like(o_ref)

    y = jnp.dot(h_ref[...], w_ref[0], preferred_element_type=jnp.float32)
    mask = ntype_ref[...] == t
    o_ref[...] = jnp.where(mask, y, o_ref[...])

    @pl.when(t == pl.num_programs(1) - 1)
    def _():
        g = gate_ref[...]                        # (TM, 1), already sigmoid(skip[ntype])
        o_ref[...] = o_ref[...] * g + x_ref[...] * (1.0 - g)


def typed_linear_skip(h, w, ntype2d, x, gate2d):
    n, d_in = h.shape
    num_types, _, d_out = w.shape
    tm = _row_tile(n)
    return pl.pallas_call(
        _typed_linear_skip_kernel,
        out_shape=jax.ShapeDtypeStruct((n, d_out), jnp.float32),
        grid=(n // tm, num_types),
        in_specs=[
            pl.BlockSpec((tm, 1), lambda i, t: (i, 0)),
            pl.BlockSpec((tm, d_in), lambda i, t: (i, 0)),
            pl.BlockSpec((1, d_in, d_out), lambda i, t: (t, 0, 0)),
            pl.BlockSpec((tm, d_out), lambda i, t: (i, 0)),
            pl.BlockSpec((tm, 1), lambda i, t: (i, 0)),
        ],
        out_specs=pl.BlockSpec((tm, d_out), lambda i, t: (i, 0)),
        compiler_params=_cparams("parallel", "arbitrary"),
    )(ntype2d, h, w, x, gate2d)


# ----------------------------------------------------------------------------
# Host-side glue: weight re-layout, edge gathers, per-dst softmax shift.
# ----------------------------------------------------------------------------
def _rel_block_diag(w_att, w_msg, scale):
    """(H,T,D,D) x2 -> (T, 2HD, 2HD) block diagonal: diag(scale*W_att heads, W_msg heads)."""
    h, t, d, _ = w_att.shape
    hd = h * d
    out = jnp.zeros((t, 2 * hd, 2 * hd), jnp.float32)
    for i in range(h):
        out = out.at[:, i * d:(i + 1) * d, i * d:(i + 1) * d].set(
            w_att[i] * scale[i][:, None, None])
        out = out.at[:, hd + i * d:hd + (i + 1) * d, hd + i * d:hd + (i + 1) * d].set(
            w_msg[i])
    return out


def hgt_forward(params, x, ntype, etype, src, dst):
    num_heads = params["num_heads"]
    head_size = params["head_size"]
    hd = num_heads * head_size
    n = x.shape[0]
    e = etype.shape[0]
    sqrt_d = math.sqrt(head_size)

    ntype2d = ntype.astype(jnp.int32).reshape(n, 1)
    etype2d = etype.astype(jnp.int32).reshape(e, 1)

    # --- fused k/v/q projection: one typed matmul, x read once ---------------
    # Order [k | v | q] so the edge kernel's (k || v) operand is one contiguous slice.
    w_kvq = jnp.concatenate([params["w_k"], params["w_v"], params["w_q"]], axis=-1)
    kvq = typed_linear(x, w_kvq, ntype2d)                     # (N, 3*H*D)

    # gather node projections to edges (lane-dense (E, *) layouts, no transposes)
    # TODO(synk): move these gathers in-kernel (pl.Element / manual DMA gather on src/dst).
    kvq_src = jnp.take(kvq, src, axis=0)
    ekv = kvq_src[:, :2 * hd]                                 # (E, 2HD) = [k | v] at src
    eq = jnp.take(kvq, dst, axis=0)[:, 2 * hd:]               # (E, HD)  = q at dst

    # --- per-edge attention logits + messages (one fused relation matmul) ----
    scale = params["pri"] / sqrt_d                            # fold pri/sqrt(D) into W_att
    w_rel_bd = _rel_block_diag(params["w_att"], params["w_msg"], scale)   # (T_e, 2HD, 2HD)
    sel = jnp.repeat(jnp.eye(num_heads, dtype=jnp.float32), head_size, axis=0)  # (HD, H)

    a, m = edge_attention(ekv, eq, etype2d, w_rel_bd, sel)    # (E,H) f32, (E,HD) bf16

    # --- edge softmax + destination aggregation (fused in the agg kernel) ----
    # per-destination shift for numerical stability; segment_max + gather are cheap O(E) glue
    amax = jax.ops.segment_max(a, dst, num_segments=n)        # (N, H)
    amax_e = jnp.take(amax, dst, axis=0)                      # (E, H)
    dst2d = dst.astype(jnp.int32).reshape(1, e)
    expander = sel.T                                          # (H, HD)
    h_agg = softmax_aggregate(dst2d, a, amax_e, m, expander, n)   # (N, H*D) f32

    # --- final typed linear fused with the sigmoid-gated skip ----------------
    # dropout(p=0.2) deliberately omitted: eval-mode identity.
    gate2d = jax.nn.sigmoid(jnp.take(params["skip"], ntype)).reshape(n, 1)
    return typed_linear_skip(h_agg, params["w_a"], ntype2d, x, gate2d)


# ----------------------------------------------------------------------------
# Pure-JAX f32 reference (same math via segment ops) for correctness check
# ----------------------------------------------------------------------------
def hgt_reference(params, x, ntype, etype, src, dst):
    num_heads = params["num_heads"]
    head_size = params["head_size"]
    n = x.shape[0]
    sqrt_d = math.sqrt(head_size)

    k = jnp.einsum("ni,nio->no", x, params["w_k"][ntype]).reshape(n, num_heads, head_size)
    q = jnp.einsum("ni,nio->no", x, params["w_q"][ntype]).reshape(n, num_heads, head_size)
    v = jnp.einsum("ni,nio->no", x, params["w_v"][ntype]).reshape(n, num_heads, head_size)
    ks, qd, vs = k[src], q[dst], v[src]
    kw = jnp.einsum("ehd,hedo->eho", ks, params["w_att"][:, etype])
    a = jnp.sum(kw * qd, axis=-1) * params["pri"][:, etype].T / sqrt_d      # (E, H)
    msg = jnp.einsum("ehd,hedo->eho", vs, params["w_msg"][:, etype])        # (E, H, D)
    amax = jax.ops.segment_max(a, dst, num_segments=n)
    ea = jnp.exp(a - amax[dst])
    den = jax.ops.segment_sum(ea, dst, num_segments=n)
    att = ea / den[dst]
    h = jax.ops.segment_sum(msg * att[..., None], dst, num_segments=n).reshape(n, -1)
    h = jnp.einsum("ni,nio->no", h, params["w_a"][ntype])
    alpha = jax.nn.sigmoid(params["skip"][ntype])[:, None]
    return h * alpha + x * (1.0 - alpha)


if __name__ == "__main__":
    in_size = 32
    head_size = 8
    num_heads = 4        # in_size == head_size * num_heads (identity residual path)
    num_ntypes = 3
    num_etypes = 5
    n_nodes = 16
    n_edges = 64

    key = jax.random.PRNGKey(0)
    keys = jax.random.split(key, 11)

    x = jax.random.normal(keys[0], (n_nodes, in_size), dtype=jnp.float32)
    ntype = jax.random.randint(keys[1], (n_nodes,), 0, num_ntypes, dtype=jnp.int32)
    etype = jax.random.randint(keys[2], (n_edges,), 0, num_etypes, dtype=jnp.int32)
    src = jax.random.randint(keys[3], (n_edges,), 0, n_nodes, dtype=jnp.int32)
    dst = jax.random.randint(keys[4], (n_edges,), 0, n_nodes, dtype=jnp.int32)

    out_size = head_size * num_heads

    def xavier(k, shape):
        fan_in, fan_out = shape[-2], shape[-1]
        lim = math.sqrt(6.0 / (fan_in + fan_out))
        return jax.random.uniform(k, shape, jnp.float32, -lim, lim)

    params = {
        "num_heads": num_heads,
        "head_size": head_size,
        "w_k": xavier(keys[5], (num_ntypes, in_size, out_size)),
        "w_q": xavier(keys[6], (num_ntypes, in_size, out_size)),
        "w_v": xavier(keys[7], (num_ntypes, in_size, out_size)),
        "w_a": xavier(keys[8], (num_ntypes, out_size, out_size)),
        "w_att": xavier(keys[9], (num_heads, num_etypes, head_size, head_size)),
        "w_msg": xavier(keys[10], (num_heads, num_etypes, head_size, head_size)),
        "pri": jnp.ones((num_heads, num_etypes), jnp.float32),   # torch init: ones
        "skip": jnp.ones((num_ntypes,), jnp.float32),            # torch init: ones
    }

    out = hgt_forward(params, x, ntype, etype, src, dst)
    out = jax.block_until_ready(out)

    ref = hgt_reference(params, x, ntype, etype, src, dst)
    # Tolerance loosened vs. pure-f32 because the message/aggregation path uses bf16 MXU
    # operands (attention-logit path remains f32, so errors stay ~1e-2 at worst).
    np.testing.assert_allclose(np.asarray(out), np.asarray(ref), rtol=2e-2, atol=2e-2)
    print("KERNEL_OK")
</pallas_src>

<mosaic_0001>
module attributes {stable_mosaic.version = 11 : i64} {
  func.func @_typed_linear_kernel(%arg0: i32, %arg1: i32, %arg2: memref<16x1xi32, #tpu.memory_space<vmem>>, %arg3: memref<16x32xf32, #tpu.memory_space<vmem>>, %arg4: memref<1x32x96xf32, #tpu.memory_space<vmem>>, %arg5: memref<16x96xf32, #tpu.memory_space<vmem>>) attributes {dimension_semantics = [#tpu.dimension_semantics<parallel>, #tpu.dimension_semantics<arbitrary>], iteration_bounds = array<i64: 1, 3>, scalar_prefetch = 0 : i64, scratch_operands = 0 : i64, tpu.core_type = #tpu.core_type<tc>, window_params = [{transform_indices = @transform_0, window_bounds = array<i64: 16, 1>}, {transform_indices = @transform_1, window_bounds = array<i64: 16, 32>}, {transform_indices = @transform_2, window_bounds = array<i64: 1, 32, 96>}, {transform_indices = @transform_3, window_bounds = array<i64: 16, 96>}]} {
    %c0_i32 = arith.constant 0 : i32
    %0 = arith.cmpi eq, %arg1, %c0_i32 : i32
    %1 = arith.extui %0 : i1 to i32
    %c0_i32_0 = arith.constant 0 : i32
    %2 = arith.cmpi ne, %1, %c0_i32_0 : i32
    scf.if %2 {
      %cst_11 = arith.constant 0.000000e+00 : f32
      %15 = vector.broadcast %cst_11 : f32 to vector<16x96xf32>
      %c0_12 = arith.constant 0 : index
      %c0_13 = arith.constant 0 : index
      %16 = vector.load %arg5[%c0_12, %c0_13] : memref<16x96xf32, #tpu.memory_space<vmem>>, vector<16x96xf32>
      tpu.vector_store %arg5[%c0_12, %c0_13], %15 {strides = array<i32>} : memref<16x96xf32, #tpu.memory_space<vmem>>, vector<16x96xf32>,
    } else {
    }
    %c0 = arith.constant 0 : index
    %c0_1 = arith.constant 0 : index
    %3 = vector.load %arg3[%c0, %c0_1] : memref<16x32xf32, #tpu.memory_space<vmem>>, vector<16x32xf32>
    %c0_2 = arith.constant 0 : index
    %c0_3 = arith.constant 0 : index
    %c0_4 = arith.constant 0 : index
    %4 = vector.load %arg4[%c0_2, %c0_3, %c0_4] : memref<1x32x96xf32, #tpu.memory_space<vmem>>, vector<1x32x96xf32>
    %5 = vector.shape_cast %4 : vector<1x32x96xf32> to vector<32x96xf32>
    %cst = arith.constant dense<0.000000e+00> : vector<16x96xf32>
    %6 = tpu.matmul %3, %5, %cst {dimension_numbers = #tpu.dot_dimension_numbers<[1], [0], [0], [1], [0, 0, 1, 1], [], []>} : vector<16x32xf32>, vector<32x96xf32>, vector<16x96xf32> -> vector<16x96xf32>
    %c0_5 = arith.constant 0 : index
    %c0_6 = arith.constant 0 : index
    %7 = vector.load %arg2[%c0_5, %c0_6] : memref<16x1xi32, #tpu.memory_space<vmem>>, vector<16x1xi32>
    %8 = vector.broadcast %arg1 : i32 to vector<16x1xi32>
    %9 = arith.cmpi eq, %7, %8 : vector<16x1xi32>
    %c0_7 = arith.constant 0 : index
    %c0_8 = arith.constant 0 : index
    %10 = vector.load %arg5[%c0_7, %c0_8] : memref<16x96xf32, #tpu.memory_space<vmem>>, vector<16x96xf32>
    %11 = vector.shape_cast %9 : vector<16x1xi1> to vector<16x1xi1>
    %12 = vector.broadcast %11 : vector<16x1xi1> to vector<16x96xi1>
    %13 = arith.select %12, %6, %10 : vector<16x96xi1>, vector<16x96xf32>
    %c0_9 = arith.constant 0 : index
    %c0_10 = arith.constant 0 : index
    %14 = vector.load %arg5[%c0_9, %c0_10] : memref<16x96xf32, #tpu.memory_space<vmem>>, vector<16x96xf32>
    tpu.vector_store %arg5[%c0_9, %c0_10], %13 {strides = array<i32>} : memref<16x96xf32, #tpu.memory_space<vmem>>, vector<16x96xf32>,
    return
  }
  func.func @transform_0(%arg0: i32, %arg1: i32) -> (i32, i32) {
    %c0_i32 = arith.constant 0 : i32
    %c0_i32_0 = arith.constant 0 : i32
    return %arg0, %c0_i32 : i32, i32
  }
  func.func @transform_1(%arg0: i32, %arg1: i32) -> (i32, i32) {
    %c0_i32 = arith.constant 0 : i32
    %c0_i32_0 = arith.constant 0 : i32
    return %arg0, %c0_i32 : i32, i32
  }
  func.func @transform_2(%arg0: i32, %arg1: i32) -> (i32, i32, i32) {
    %c0_i32 = arith.constant 0 : i32
    %c0_i32_0 = arith.constant 0 : i32
    %c0_i32_1 = arith.constant 0 : i32
    return %arg1, %c0_i32, %c0_i32_0 : i32, i32, i32
  }
  func.func @transform_3(%arg0: i32, %arg1: i32) -> (i32, i32) {
    %c0_i32 = arith.constant 0 : i32
    %c0_i32_0 = arith.constant 0 : i32
    return %arg0, %c0_i32 : i32, i32
  }
}

</mosaic_0001>

<bundles_post_ra>
// kernel: tpu_custom_call.1
= control target key start
LH: loop header
LB: loop body
LE: loop exit
PB: predicated region body
PF: predicated region fallthrough
CT: control target
= control target key end

     0   :  { %8 = vsyncpa [#allocation3], 0  ;;  %s825_s0 = inlined_call_operand.vmem [shape: s32[16,1], index: 0, kind: input, shape index: {}]   ;;  %s826_s1 = inlined_call_operand.vmem [shape: f32[16,32], index: 1, kind: input, shape index: {}]   ;;  %s827_s2 = inlined_call_operand.hbm [shape: f32[3,32,96], index: 2, kind: input, shape index: {}]   ;;  %s828_s3 = inlined_call_operand.hbm [shape: f32[16,96], index: 3, kind: output, shape index: {}]  }
   0x1   :  { %10 = vsyncpa [#allocation3 + $0x1], 0 }
   0x2   :  { %11 = vsyncpa [#allocation4], 0  ;;  %s699_s12 = smov 0   ;;  %s701_s13 = smov 0  }
   0x3   :  { %s703_s14 = smov 0   ;;  %s705_s15 = smov 0  }
   0x4   :  { %s707_s16 = smov 0   ;;  %s709_s17 = smov 0  }
   0x5 LB: > { %s459_s18 = sadd.s32 4294967295, %s669_s17   ;;  %s26_s19 = sadd.s32 1, %s665_s16  ;;  %s669_s17 = sphi %s709_s17, %s17_s17   ;;  %s665_s16 = sphi %s707_s16, %s837_s16   ;;  %s661_s15 = sphi %s705_s15, %s836_s15   ;;  %s657_s14 = sphi %s703_s14, %s835_s14   ;;  %s653_s13 = sphi %s701_s13, %s834_s13   ;;  %s649_s12 = sphi %s699_s12, %s833_s12  }
   0x6   : > { %p27_p0 = scmp.ge.s32.totalorder %s26_s19, 3  ;;  %s88_s20 = sadd.s32 1, %s657_s14 }
   0x7   : > { %p95_p1 = scmp.ne.s32.totalorder %s657_s14, %s653_s13  ;;  %p96_p2 = scmp.eq.s32.totalorder %s669_s17, 0 }
   0x8   : > { %s839_s19 = smov (%p27_p0, %s26_s19), 0  ;;  %p101_p4 = scmp.ne.s32.totalorder %s653_s13, %s649_s12 }
   0x9   : > { %p735_p3 = por %p96_p2, %p95_p1  ;;  %s85_s22 = ssub.s32 %s665_s16, %s839_s19 }
   0xa   : > { %p102_p5 = scmp.eq.s32.totalorder %s459_s18, 0  ;;  %p86_p6 = scmp.eq.s32.totalorder %s85_s22, 0 }
   0xb   : > { %p504_p8 = scmp.lt.s32.totalorder %s669_s17, 3  ;;  %s169_s25 = sand.u32 1, %s657_s14  }
   0xc   : > { %p744_p7 = por %p102_p5, %p101_p4  ;;  %s476_s26 = sshll.u32 %s665_s16, 9 }
   0xd   : > { %s750_s24 = scalar_select %p86_p6, %s657_s14, %s88_s20  }
   0xe   : > { %s464_s27 = sshll.u32 %s169_s25, 5  ;;  %s179_s30 = scalar_lea.hbm %s827_s2, %s476_s26 }
   0xf   : > { %s173_s4 = scalar_lea.vmem [#allocation2], %s464_s27  ;;  %p759_p9 = pnand %p504_p8, %p735_p3 }
  0x10   : > { %s180_s5 = sshll.u32 %s173_s4, 4  ;;  %s170_s7 = scalar_lea.sflag [#allocation3], %s169_s25  ;;  %s181_s5 = int_to_ptr.vmem [resolvable:$true] %s180_s5 }
  0x11   : > { %p565_p10 = pneg %p759_p9  ;;  %s576_s8 = scalar_lea.vmem %s181_s5, 512 }
  0x12   : > { %p577_p11 = scmp.ne.s32.totalorder %s181_s5, %s576_s8  ;;  %s671_s9 = smov [#allocation2]  }
  0x13   : > { %s581_s10 = sshll.u32 %s671_s9, 4  ;;  %s582_s10 = int_to_ptr.vmem [resolvable:$false] %s581_s10 }
  0x14   : > { %p579_p12 = pnand %p577_p11, %p565_p10  ;;  %s583_s11 = scalar_lea.vmem %s582_s10, 1024 }
  0x15   : > { %p584_p0 = scmp.lt.s32.totalorder %s181_s5, %s582_s10  ;;  %p585_p1 = scmp.lt.s32.totalorder %s583_s11, %s576_s8 }
  0x16   : > { %p580_p13 = pneg %p579_p12 }
  0x17   : > { %p586_p2 = por %p585_p1, %p584_p0 }
  0x19   : > { %p587_p3 = pnand %p586_p2, %p580_p13 }
  0x1b   : > { %590 = shalt.err (!%p587_p3)
}
  0x1c   : > { %s672_s12 = smov 128   ;;  %s673_s20 = smov 8  }
  0x1d   : > { %503 = dma.hbm_to_vmem [thread:$0]  (!%p759_p9), %s179_s30, 512, %s181_s5, %s170_s7, %s672_s12, %s672_s12, %s673_s20  }
  0x1e   : > { %p467_p4 = scmp.ge.s32.totalorder %s669_s17, 1  ;;  %p188_p5 = scmp.lt.s32.totalorder %s669_s17, 4 }
  0x20   : > { %p189_p6 = pnand %p467_p4, %p188_p5 }
  0x21   : > { %s194_s21 = sand.u32 (!%p189_p6), 1, %s653_s13  }
  0x22   : > { %192 = sbr.rel (%p189_p6) target bundleno = 260 (0x104), region = 32  ;;  %s468_s22 = sshll.u32 (!%p189_p6), %s194_s21, 5 }
  0x23   : > { %s195_s25 = scalar_lea.sflag (!%p189_p6), [#allocation3], %s194_s21  ;;  %s198_s26 = scalar_lea.vmem (!%p189_p6), [#allocation2], %s468_s22 }
  0x27   : > { %640 = dma.done.wait (%p744_p7), %s195_s25, 512  }
  0x28   : > { %642 = vsyncadd (%p744_p7), %s195_s25, 4294966784  ;;  %p469_p8 = scmp.ne.s32.totalorder %s661_s15, 0 }
  0x2a   : > { %242 = sbr.rel (%p469_p8) target bundleno = 49 (0x31), region = 40 }
  0x2f   : > { %vm243_vm0 = vcmask 785408   ;;  %v674_v0 = vmov 0.0  }
  0x30   : > { %244 = vst.msk [vmem:[#allocation5] sm:$0xff] %vm243_vm0, %v674_v0  ;;  %245 = vst.msk [vmem:[#allocation5 + $0x8] sm:$0xff] %vm243_vm0, %v674_v0 }
  0x31 PF: > { %v251_v1 = vld [vmem:[%s198_s26 + $0x18] sm:$0xff]  ;;  %v250_v2 = vld [vmem:[%s198_s26 + $0x10] sm:$0xff]  ;;  %vm252_vm1 = vcmask 261120   ;;  %v336_v3 = vstv %s661_s15  ;;  %v246_v4 = vld [vmem:[%s826_s1] sm:$0xff]  ;;  %v675_v5 = vmov 0   ;;  %s676_s6 = smov [#allocation5]  }
  0x32   : > { %483 = vmatprep.subr.mxu0 %v251_v1  ;;  %562 = vset.pattern.permute.xlu0 %v675_v5  ;;  %v249_v6 = vld [vmem:[%s198_s26 + $0x8] sm:$0xff]  ;;  %v334_v7 = vld [vmem:[%s825_s0] sm:$0xff]  ;;  %s365_s7 = sshll.u32 %s676_s6, 4  ;;  %vm353_vm4 = vcmask 785408   ;;  %p792_p7 = scmp.eq.s32.totalorder %s459_s18, 2  ;;  %s366_s7 = int_to_ptr.vmem [resolvable:$true] %s365_s7 }
  0x33   : > { %484 = vmatpush3.msra.mxu0 %v251_v1  ;;  %491 = vmatprep.mubr.msk.f32.mxu0 %vm252_vm1, %v246_v4  ;;  %v335_v8 = vld [vmem:[%s825_s0 + $0x8] sm:$0xff]  ;;  %vm337_vm2 = vcmp.eq.s32.totalorder %v334_v7, %v336_v3  ;;  %v248_v9 = vld [vmem:[%s198_s26] sm:$0xff]  ;;  %s591_s9 = scalar_lea.vmem %s366_s7, 256  ;;  %p598_p12 = scmp.lt.s32.totalorder %s366_s7, %s366_s7 }
  0x34   : > { %485 = vmatprep.subr.mxu0 %v250_v2  ;;  %vm338_vm3 = vcmp.eq.s32.totalorder %v335_v8, %v336_v3  ;;  %v341_v10 = vsel %vm337_vm2, 1, %v675_v5  ;;  %v247_v11 = vld [vmem:[%s826_s1 + $0x8] sm:$0xff]  ;;  %p592_p9 = scmp.ne.s32.totalorder %s366_s7, %s591_s9  ;;  %p599_p13 = scmp.lt.s32.totalorder %s591_s9, %s591_s9 }
  0x35   : > { %486 = vmatpush3.msra.mxu0 %v250_v2  ;;  %344 = vperm.xlu0 %562, %v341_v10   ;;  %v342_v12 = vsel %vm338_vm3, 1, %v675_v5 }
  0x36   : > { %487 = vmatprep.subr.mxu0 %v249_v6  ;;  %p593_p10 = pnand %p592_p9, %p792_p7  ;;  %p600_p0 = por %p599_p13, %p598_p12 }
  0x37   : > { %488 = vmatpush3.msra.mxu0 %v249_v6  ;;  %v340_v15 = vld [vmem:[#allocation5 + $0x8] sm:$0xff]  ;;  %v339_v17 = vld [vmem:[#allocation5] sm:$0xff] }
  0x38   : > { %489 = vmatprep.subr.mxu0 %v248_v9  ;;  %p594_p11 = pneg %p593_p10 }
  0x39   : > { %490 = vmatpush3.msra.mxu0 %v248_v9  ;;  %347 = vperm.xlu0 %562, %v342_v12  }
  0x3a   : > { %492 = vmatmul.mubr.msk.f32.vlgmr.msra.gmra.mxu0 %vm252_vm1, %v247_v11  ;;  %p601_p1 = pnand %p600_p0, %p594_p11 }
  0xb0   : > { %v345_v13 = vpop.permute.xlu0 %344 }
  0xb1   : > { %vm349_vm6 = vcmp.eq.s32.totalorder %v345_v13, 1 }
  0xb4   : > { %v348_v14 = vpop.permute.xlu0 %347 }
  0xb5   : > { %vm350_vm5 = vcmp.eq.s32.totalorder %v348_v14, 1 }
  0xfa   : > { %v493_v16 = vpop.f32.mrf.mxu0 }
  0xfb   : > { %v352_v18 = vsel %vm350_vm5, %v493_v16, %v340_v15 }
  0xfc   : > { %355 = vst.msk [vmem:[#allocation5 + $0x8] sm:$0xff] %vm353_vm4, %v352_v18  ;;  %v325_v19 = vpop.f32.mrf.mxu0 }
  0xfd   : > { %v351_v20 = vsel %vm349_vm6, %v325_v19, %v339_v17 }
  0xfe   : > { %354 = vst.msk [vmem:[#allocation5] sm:$0xff] %vm353_vm4, %v351_v20 }
  0xff   : > { %604 = shalt.err (!%p601_p1)
}
 0x100   : > { %s677_s18 = smov 128   ;;  %s678_s10 = smov 8  }
 0x101   : > { %497 = dma.vmem_to_hbm [thread:$0]  (%p792_p7), %s366_s7, 256, %s828_s3, [#allocation4], %s677_s18, %s677_s18, %s678_s10  }
 0x102   : > { %644 = dma.done.wait (%p792_p7), [#allocation4], 256  }
 0x103   : > { %646 = vsyncadd (%p792_p7), [#allocation4], 4294967040 }
 0x104 PF: > { %s17_s17 = sadd.s32 1, %s669_s17   ;;  %s833_s12 = smov %s653_s13 }
 0x105   : > { %p14_p2 = scmp.ge.s32.totalorder %s17_s17, 5   ;;  %s834_s13 = smov %s657_s14 }
 0x106   : > { %s835_s14 = smov %s750_s24  ;;  %s836_s15 = smov %s665_s16 }
 0x107   : > { %s837_s16 = smov %s839_s19  ;;  %16 = sbr.rel (!%p14_p2) target bundleno = 5 (0x5), region = 80 }
 0x10c   :  { %381 = vsyncpa [#allocation3], 1 }
 0x10d   :  { %383 = vsyncpa [#allocation3 + $0x1], 1 }
 0x10e   :  { %384 = vsyncpa [#allocation4], 1 }
 0x10f   :  { %386 = vsyncpa [#allocation4 + $0x1], 1 }

</bundles_post_ra>
